<compile_context>
chip_gen: v6e
topology: v6e:2x2x1
jax: 0.10.0
libtpu: 0.0.40
codegen_flags: <defaults>
</compile_context>

<pallas_src>
from functools import partial

import jax
import jax.numpy as jnp
from jax.experimental import pallas as pl
from jax.experimental.pallas import tpu as pltpu


VMEM_LIMIT = 48 * 1024 * 1024   # safe on v5e/v6e/v7x, above default scoped limits


def _cdiv(a, b):
    return -(-a // b)


def _round_up(x, m):
    return _cdiv(x, m) * m


def _row_tile(m, cap=512):
    """Row tile that is a multiple of 8 and minimizes padding waste."""
    nm = max(1, _cdiv(m, cap))
    tm = _round_up(_cdiv(m, nm), 8)
    return tm, nm * tm


def _pick_tn(n):
    """Lane tile for the matmul N axis (exposes a parallel grid dim for big N)."""
    if n <= 640:
        return n
    for t in (512, 384, 256, 128):
        if n % t == 0:
            return t
    return n


# ---------------------------------------------------------------------------
# Pallas kernels
# ---------------------------------------------------------------------------

def _mm_bn_act_kernel(x_ref, w_ref, s_ref, b_ref, o_ref, *, act):
    """(tm,K)@(K,tn) bf16 on the MXU, f32 accumulate, fused BN-affine + act."""
    y = jnp.dot(x_ref[...], w_ref[...], preferred_element_type=jnp.float32)
    y = y * s_ref[...] + b_ref[...]
    if act == "silu":
        y = y * jax.nn.sigmoid(y)
    o_ref[...] = y.astype(o_ref.dtype)


def _mbconv_core_kernel(p_ref, dw_ref, s2_ref, b2_ref,
                        rw_ref, rb_ref, ew_ref, eb_ref,
                        pw_ref, s3_ref, b3_ref, *rest,
                        k, stride, ho, wo, inv_hw, has_skip, flat_ok):
    """Fused MBConv core (per batch element):

    depthwise kxk conv (from stride^2 parity planes) + BN + SiLU
      -> GAP -> SE fc+SiLU -> SE fc+sigmoid (gate)
      -> gate * act -> 1x1 project matmul + BN (-> + residual)

    p_ref : (S*S, Hq, Wq, C) parity planes (unit-stride taps), bf16
    dw_ref: (k*k, C) f32 depthwise weights
    rw/ew : SE reduce/expand fc weights (bf16), rb/eb their biases (f32)
    pw_ref: (C, Cout) bf16 projection weights
    rest  : [shortcut (HWo, Cout) bf16]? , out (HWo, Cout) bf16
    """
    if has_skip:
        sc_ref, o_ref = rest
    else:
        (o_ref,) = rest
    S = stride
    C = dw_ref.shape[1]

    # --- depthwise conv: unrolled K*K unit-stride taps, f32 accumulate ------
    w = dw_ref[...].astype(jnp.float32)                       # (k*k, C)
    acc = jnp.zeros((ho, wo, C), jnp.float32)
    for di in range(k):
        for dj in range(k):
            plane = (di % S) * S + (dj % S)
            r0, c0 = di // S, dj // S
            tap = p_ref[plane, r0:r0 + ho, c0:c0 + wo, :].astype(jnp.float32)
            acc = acc + tap * w[di * k + dj]

    # BN + SiLU
    y = acc * s2_ref[...] + b2_ref[...]
    y = y * jax.nn.sigmoid(y)                                  # (ho, wo, C) f32

    # --- squeeze & excite: GAP -> fc + SiLU -> fc + sigmoid ----------------
    g = jnp.sum(jnp.sum(y, axis=0), axis=0, keepdims=True) * inv_hw   # (1, C)
    h = jnp.dot(g.astype(jnp.bfloat16), rw_ref[...],
                preferred_element_type=jnp.float32) + rb_ref[...]
    h = h * jax.nn.sigmoid(h)
    e = jnp.dot(h.astype(jnp.bfloat16), ew_ref[...],
                preferred_element_type=jnp.float32) + eb_ref[...]
    gate = jax.nn.sigmoid(e)                                   # (1, C) f32

    yg = y * gate                                              # (ho, wo, C) f32

    # --- SE-gated 1x1 projection + BN (+ residual) --------------------------
    s3 = s3_ref[...]
    b3 = b3_ref[...]
    if flat_ok:
        # Wo % 8 == 0 -> (ho, wo, C) -> (ho*wo, C) is layout-trivial.
        ym = yg.reshape(ho * wo, C).astype(jnp.bfloat16)
        z = jnp.dot(ym, pw_ref[...], preferred_element_type=jnp.float32)
        z = z * s3 + b3
        if has_skip:
            z = z + sc_ref[...].astype(jnp.float32)
        o_ref[...] = z.astype(o_ref.dtype)
    else:
        # tiny late stages (wo in {2,4}): short unrolled per-row matmul loop
        for hi in range(ho):
            zm = yg[hi].astype(jnp.bfloat16)                   # (wo, C)
            z = jnp.dot(zm, pw_ref[...], preferred_element_type=jnp.float32)
            z = z * s3 + b3
            if has_skip:
                z = z + sc_ref[hi * wo:(hi + 1) * wo, :].astype(jnp.float32)
            o_ref[hi * wo:(hi + 1) * wo, :] = z.astype(o_ref.dtype)


def _head_tail_kernel(x_ref, hw_ref, hs_ref, hb_ref, cw_ref, cb_ref, o_ref, *, inv_hw):
    """Fused network tail: 1x1 head conv + BN + SiLU -> GAP -> Linear classifier."""
    y = jnp.dot(x_ref[...], hw_ref[...], preferred_element_type=jnp.float32)
    y = y * hs_ref[...] + hb_ref[...]
    y = y * jax.nn.sigmoid(y)
    g = jnp.sum(y, axis=0, keepdims=True) * inv_hw            # (1, head_ch)
    logits = jnp.dot(g.astype(jnp.bfloat16), cw_ref[...],
                     preferred_element_type=jnp.float32) + cb_ref[...]
    o_ref[...] = logits


# ---------------------------------------------------------------------------
# Pallas wrappers (jitted; identical shapes reuse compiled kernels)
# ---------------------------------------------------------------------------

@partial(jax.jit, static_argnames=("act",))
def matmul_bn_act(x, w, scale, bias, act="none"):
    """act((x @ w) * scale + bias); x:(M,K), w:(K,N) -> (M,N) bf16."""
    M, K = x.shape
    N = w.shape[1]
    tm, Mp = _row_tile(M)
    if Mp != M:
        x = jnp.pad(x, ((0, Mp - M), (0, 0)))
    tn = _pick_tn(N)
    out = pl.pallas_call(
        partial(_mm_bn_act_kernel, act=act),
        out_shape=jax.ShapeDtypeStruct((Mp, N), jnp.bfloat16),
        grid=(Mp // tm, N // tn),
        in_specs=[
            pl.BlockSpec((tm, K), lambda i, j: (i, 0)),
            pl.BlockSpec((K, tn), lambda i, j: (0, j)),
            pl.BlockSpec((1, tn), lambda i, j: (0, j)),
            pl.BlockSpec((1, tn), lambda i, j: (0, j)),
        ],
        out_specs=pl.BlockSpec((tm, tn), lambda i, j: (i, j)),
        compiler_params=pltpu.CompilerParams(
            dimension_semantics=("parallel", "parallel"),
            vmem_limit_bytes=VMEM_LIMIT),
    )(x.astype(jnp.bfloat16), w.astype(jnp.bfloat16),
      scale.reshape(1, N).astype(jnp.float32),
      bias.reshape(1, N).astype(jnp.float32))
    return out[:M] if Mp != M else out


@partial(jax.jit, static_argnames=("k", "stride"))
def mbconv_core(x, shortcut, dw_w, bn2_s, bn2_b, se_rw, se_rb, se_ew, se_eb,
                proj_w, bn3_s, bn3_b, *, k, stride):
    """Fused dw-conv + BN + SiLU + SE + gated 1x1 project + BN (+ residual).

    x: (B, H, W, C) bf16 (post-expand activation), shortcut: (B,Ho*Wo,Cout) | None.
    Returns (B, Ho*Wo, Cout) bf16.  The activation is split once into
    stride^2 parity planes (total bytes = 1x the activation) so every tap is a
    unit-stride VMEM window read inside the kernel.
    """
    B, H, W, C = x.shape
    S = stride
    p = k // 2
    Ho = (H + 2 * p - k) // S + 1
    Wo = (W + 2 * p - k) // S + 1
    Hq = Ho + (k - 1) // S
    Wq = Wo + (k - 1) // S
    Hp, Wp = S * Hq, S * Wq
    xp = jnp.pad(x.astype(jnp.bfloat16),
                 ((0, 0), (p, Hp - H - p), (p, Wp - W - p), (0, 0)))
    planes = xp.reshape(B, Hq, S, Wq, S, C).transpose(0, 2, 4, 1, 3, 5)
    planes = planes.reshape(B, S * S, Hq, Wq, C)

    Cout = proj_w.shape[1]
    Se = se_rw.shape[1]
    HWo = Ho * Wo
    has_skip = shortcut is not None
    flat_ok = (Wo % 8 == 0)

    in_specs = [
        pl.BlockSpec((None, S * S, Hq, Wq, C), lambda b: (b, 0, 0, 0, 0)),
        pl.BlockSpec((k * k, C), lambda b: (0, 0)),
        pl.BlockSpec((1, C), lambda b: (0, 0)),
        pl.BlockSpec((1, C), lambda b: (0, 0)),
        pl.BlockSpec((C, Se), lambda b: (0, 0)),
        pl.BlockSpec((1, Se), lambda b: (0, 0)),
        pl.BlockSpec((Se, C), lambda b: (0, 0)),
        pl.BlockSpec((1, C), lambda b: (0, 0)),
        pl.BlockSpec((C, Cout), lambda b: (0, 0)),
        pl.BlockSpec((1, Cout), lambda b: (0, 0)),
        pl.BlockSpec((1, Cout), lambda b: (0, 0)),
    ]
    args = [planes,
            dw_w.astype(jnp.float32),
            bn2_s.reshape(1, C).astype(jnp.float32),
            bn2_b.reshape(1, C).astype(jnp.float32),
            se_rw.astype(jnp.bfloat16),
            se_rb.reshape(1, Se).astype(jnp.float32),
            se_ew.astype(jnp.bfloat16),
            se_eb.reshape(1, C).astype(jnp.float32),
            proj_w.astype(jnp.bfloat16),
            bn3_s.reshape(1, Cout).astype(jnp.float32),
            bn3_b.reshape(1, Cout).astype(jnp.float32)]
    if has_skip:
        in_specs.append(pl.BlockSpec((None, HWo, Cout), lambda b: (b, 0, 0)))
        args.append(shortcut.astype(jnp.bfloat16))

    out = pl.pallas_call(
        partial(_mbconv_core_kernel, k=k, stride=S, ho=Ho, wo=Wo,
                inv_hw=1.0 / HWo, has_skip=has_skip, flat_ok=flat_ok),
        out_shape=jax.ShapeDtypeStruct((B, HWo, Cout), jnp.bfloat16),
        grid=(B,),
        in_specs=in_specs,
        out_specs=pl.BlockSpec((None, HWo, Cout), lambda b: (b, 0, 0)),
        compiler_params=pltpu.CompilerParams(
            dimension_semantics=("parallel",), vmem_limit_bytes=VMEM_LIMIT),
    )(*args)
    return out


@jax.jit
def head_gap_classifier(x, hw, hs, hb, cw, cb):
    """Fused tail: head 1x1 conv + BN + SiLU -> GAP -> Linear.  x:(B,HW,C)."""
    B, HW, C = x.shape
    N = hw.shape[1]
    NC = cw.shape[1]
    out = pl.pallas_call(
        partial(_head_tail_kernel, inv_hw=1.0 / HW),
        out_shape=jax.ShapeDtypeStruct((B, 1, NC), jnp.float32),
        grid=(B,),
        in_specs=[
            pl.BlockSpec((None, HW, C), lambda b: (b, 0, 0)),
            pl.BlockSpec((C, N), lambda b: (0, 0)),
            pl.BlockSpec((1, N), lambda b: (0, 0)),
            pl.BlockSpec((1, N), lambda b: (0, 0)),
            pl.BlockSpec((N, NC), lambda b: (0, 0)),
            pl.BlockSpec((1, NC), lambda b: (0, 0)),
        ],
        out_specs=pl.BlockSpec((None, 1, NC), lambda b: (b, 0, 0)),
        compiler_params=pltpu.CompilerParams(
            dimension_semantics=("parallel",), vmem_limit_bytes=VMEM_LIMIT),
    )(x.astype(jnp.bfloat16), hw.astype(jnp.bfloat16),
      hs.reshape(1, N).astype(jnp.float32), hb.reshape(1, N).astype(jnp.float32),
      cw.astype(jnp.bfloat16), cb.reshape(1, NC).astype(jnp.float32))
    return out.reshape(B, NC)


@jax.jit
def stem_conv(x_nchw, w, scale, bias):
    """Stem: 3x3 stride-2 conv (pad=1) + BN + SiLU via im2col + fused matmul.
    (Input is only 3 channels, so the 9x im2col is negligible.)"""
    x = jnp.transpose(x_nchw, (0, 2, 3, 1)).astype(jnp.bfloat16)
    B, H, W, C = x.shape
    k, s, p = 3, 2, 1
    Ho = (H + 2 * p - k) // s + 1
    Wo = (W + 2 * p - k) // s + 1
    xp = jnp.pad(x, ((0, 0), (p, p), (p, p), (0, 0)))
    cols = []
    for di in range(k):
        for dj in range(k):
            cols.append(xp[:, di:di + (Ho - 1) * s + 1:s,
                           dj:dj + (Wo - 1) * s + 1:s, :])
    patches = jnp.concatenate(cols, axis=-1).reshape(B * Ho * Wo, k * k * C)
    y = matmul_bn_act(patches, w, scale, bias, act="silu")
    return y.reshape(B, Ho, Wo, w.shape[1])


# ---------------------------------------------------------------------------
# EfficientNet-B3 parameters (deterministic synthetic, exact B3 shapes)
# ---------------------------------------------------------------------------

# (repeats, kernel, stride, expand_ratio, cin, cout)  -- B3 scaled config
B3_CONFIG = [
    (2, 3, 1, 1, 40, 24),
    (3, 3, 2, 6, 24, 32),
    (3, 5, 2, 6, 32, 48),
    (5, 3, 2, 6, 48, 96),
    (5, 5, 1, 6, 96, 136),
    (6, 5, 2, 6, 136, 232),
    (2, 3, 1, 6, 232, 384),
]
STEM_CH = 40
HEAD_CH = 1536
NUM_CLASSES = 3


def init_params(key):
    keys = iter(jax.random.split(key, 1024))

    def nk():
        return next(keys)

    def conv_w(shape, fan_in, dtype=jnp.bfloat16):
        return (jax.random.normal(nk(), shape) / jnp.sqrt(float(fan_in))).astype(dtype)

    def bn(c):
        gamma = 1.0 + 0.1 * jax.random.normal(nk(), (c,))
        beta = 0.1 * jax.random.normal(nk(), (c,))
        mean = 0.01 * jax.random.normal(nk(), (c,))
        var = jnp.ones((c,))
        scale = gamma / jnp.sqrt(var + 1e-5)
        bias = beta - mean * scale
        return scale.astype(jnp.float32), bias.astype(jnp.float32)

    params = {}
    s_scale, s_bias = bn(STEM_CH)
    params["stem"] = dict(w=conv_w((9 * 3, STEM_CH), 27), scale=s_scale, bias=s_bias)

    blocks = []
    for (r, k, s, e, cin, cout) in B3_CONFIG:
        for bi in range(r):
            cin_b = cin if bi == 0 else cout
            stride = s if bi == 0 else 1
            cmid = cin_b * e
            se_ch = max(1, int(cin_b * 0.25))
            bp = dict(kernel=k, stride=stride, expand=(e != 1),
                      has_skip=(stride == 1 and cin_b == cout))
            if e != 1:
                bp["pw_w"] = conv_w((cin_b, cmid), cin_b)
                bp["bn1_s"], bp["bn1_b"] = bn(cmid)
            bp["dw_w"] = conv_w((k * k, cmid), k * k, dtype=jnp.float32)
            bp["bn2_s"], bp["bn2_b"] = bn(cmid)
            bp["se_rw"] = conv_w((cmid, se_ch), cmid)
            bp["se_rb"] = (0.01 * jax.random.normal(nk(), (se_ch,))).astype(jnp.float32)
            bp["se_ew"] = conv_w((se_ch, cmid), se_ch)
            bp["se_eb"] = (0.01 * jax.random.normal(nk(), (cmid,))).astype(jnp.float32)
            bp["proj_w"] = conv_w((cmid, cout), cmid)
            bp["bn3_s"], bp["bn3_b"] = bn(cout)
            blocks.append(bp)
    params["blocks"] = blocks

    h_s, h_b = bn(HEAD_CH)
    params["head"] = dict(w=conv_w((384, HEAD_CH), 384), scale=h_s, bias=h_b)
    params["classifier"] = dict(
        w=(0.02 * jax.random.normal(nk(), (HEAD_CH, NUM_CLASSES))).astype(jnp.bfloat16),
        b=jnp.zeros((NUM_CLASSES,), jnp.float32))
    return params


# ---------------------------------------------------------------------------
# Forward pass
# ---------------------------------------------------------------------------

def mbconv_block(p, x):
    """MBConv / DepthwiseSeparable block (timm InvertedResidual semantics)."""
    B, H, W, Cin = x.shape
    shortcut = x.reshape(B, H * W, Cin) if p["has_skip"] else None

    # 1x1 expand conv + BN + SiLU (bf16 MXU matmul)
    if p["expand"]:
        Cmid = p["pw_w"].shape[1]
        h = matmul_bn_act(x.reshape(-1, Cin), p["pw_w"], p["bn1_s"], p["bn1_b"],
                          act="silu")
        h = h.reshape(B, H, W, Cmid)
    else:
        h = x

    # fused: depthwise conv + BN + SiLU + SE + gated 1x1 project + BN (+skip)
    out = mbconv_core(h, shortcut, p["dw_w"], p["bn2_s"], p["bn2_b"],
                      p["se_rw"], p["se_rb"], p["se_ew"], p["se_eb"],
                      p["proj_w"], p["bn3_s"], p["bn3_b"],
                      k=p["kernel"], stride=p["stride"])

    S, pd, k = p["stride"], p["kernel"] // 2, p["kernel"]
    Ho = (H + 2 * pd - k) // S + 1
    Wo = (W + 2 * pd - k) // S + 1
    return out.reshape(B, Ho, Wo, p["proj_w"].shape[1])


def efficientnet_b3_forward(params, x_nchw):
    # stem: NCHW -> NHWC, 3x3 stride-2 conv + BN + SiLU
    sp = params["stem"]
    x = stem_conv(x_nchw, sp["w"], sp["scale"], sp["bias"])

    # MBConv stages
    for bp in params["blocks"]:
        x = mbconv_block(bp, x)

    # fused tail: head 1x1 conv + BN + SiLU -> global average pool -> Linear(1536->3)
    B, H, W, C = x.shape
    hp = params["head"]
    cp = params["classifier"]
    logits = head_gap_classifier(x.reshape(B, H * W, C), hp["w"], hp["scale"],
                                 hp["bias"], cp["w"], cp["b"])
    return logits


# ---------------------------------------------------------------------------

if __name__ == "__main__":
    key = jax.random.PRNGKey(0)
    pkey, xkey = jax.random.split(key)
    params = init_params(pkey)

    # small but valid input for the B3 graph (3 RGB channels, 64x64 spatial)
    x = jax.random.normal(xkey, (2, 3, 64, 64), dtype=jnp.float32)

    logits = efficientnet_b3_forward(params, x)
    logits = jax.block_until_ready(logits)

    assert logits.shape == (2, NUM_CLASSES)
    assert bool(jnp.all(jnp.isfinite(logits)))
    print("KERNEL_OK")
</pallas_src>

<mosaic_0001>
module attributes {stable_mosaic.version = 11 : i64} {
  func.func @_mm_bn_act_kernel(%arg0: i32, %arg1: i32, %arg2: memref<512x27xbf16, #tpu.memory_space<vmem>>, %arg3: memref<27x40xbf16, #tpu.memory_space<vmem>>, %arg4: memref<1x40xf32, #tpu.memory_space<vmem>>, %arg5: memref<1x40xf32, #tpu.memory_space<vmem>>, %arg6: memref<512x40xbf16, #tpu.memory_space<vmem>>) attributes {dimension_semantics = [#tpu.dimension_semantics<parallel>, #tpu.dimension_semantics<parallel>], iteration_bounds = array<i64: 4, 1>, scalar_prefetch = 0 : i64, scratch_operands = 0 : i64, tpu.core_type = #tpu.core_type<tc>, window_params = [{transform_indices = @transform_0, window_bounds = array<i64: 512, 27>}, {transform_indices = @transform_1, window_bounds = array<i64: 27, 40>}, {transform_indices = @transform_2, window_bounds = array<i64: 1, 40>}, {transform_indices = @transform_3, window_bounds = array<i64: 1, 40>}, {transform_indices = @transform_4, window_bounds = array<i64: 512, 40>}]} {
    %c0 = arith.constant 0 : index
    %c0_0 = arith.constant 0 : index
    %0 = vector.load %arg2[%c0, %c0_0] : memref<512x27xbf16, #tpu.memory_space<vmem>>, vector<512x27xbf16>
    %c0_1 = arith.constant 0 : index
    %c0_2 = arith.constant 0 : index
    %1 = vector.load %arg3[%c0_1, %c0_2] : memref<27x40xbf16, #tpu.memory_space<vmem>>, vector<27x40xbf16>
    %cst = arith.constant dense<0.000000e+00> : vector<512x40xf32>
    %2 = tpu.matmul %0, %1, %cst {dimension_numbers = #tpu.dot_dimension_numbers<[1], [0], [0], [1], [0, 0, 1, 1], [], []>} : vector<512x27xbf16>, vector<27x40xbf16>, vector<512x40xf32> -> vector<512x40xf32>
    %c0_3 = arith.constant 0 : index
    %c0_4 = arith.constant 0 : index
    %3 = vector.load %arg4[%c0_3, %c0_4] : memref<1x40xf32, #tpu.memory_space<vmem>>, vector<1x40xf32>
    %4 = vector.broadcast %3 : vector<1x40xf32> to vector<512x40xf32>
    %5 = arith.mulf %2, %4 : vector<512x40xf32>
    %c0_5 = arith.constant 0 : index
    %c0_6 = arith.constant 0 : index
    %6 = vector.load %arg5[%c0_5, %c0_6] : memref<1x40xf32, #tpu.memory_space<vmem>>, vector<1x40xf32>
    %7 = vector.broadcast %6 : vector<1x40xf32> to vector<512x40xf32>
    %8 = arith.addf %5, %7 : vector<512x40xf32>
    %9 = arith.negf %8 : vector<512x40xf32>
    %10 = math.exp %9 : vector<512x40xf32>
    %cst_7 = arith.constant 1.000000e+00 : f32
    %11 = vector.broadcast %cst_7 : f32 to vector<512x40xf32>
    %12 = arith.addf %11, %10 : vector<512x40xf32>
    %13 = arith.divf %11, %12 : vector<512x40xf32>
    %14 = arith.mulf %8, %13 : vector<512x40xf32>
    %15 = arith.truncf %14 : vector<512x40xf32> to vector<512x40xbf16>
    %c0_8 = arith.constant 0 : index
    %c0_9 = arith.constant 0 : index
    %16 = vector.load %arg6[%c0_8, %c0_9] : memref<512x40xbf16, #tpu.memory_space<vmem>>, vector<512x40xbf16>
    tpu.vector_store %arg6[%c0_8, %c0_9], %15 {strides = array<i32>} : memref<512x40xbf16, #tpu.memory_space<vmem>>, vector<512x40xbf16>,
    return
  }
  func.func @transform_0(%arg0: i32, %arg1: i32) -> (i32, i32) {
    %c0_i32 = arith.constant 0 : i32
    %c0_i32_0 = arith.constant 0 : i32
    return %arg0, %c0_i32 : i32, i32
  }
  func.func @transform_1(%arg0: i32, %arg1: i32) -> (i32, i32) {
    %c0_i32 = arith.constant 0 : i32
    %c0_i32_0 = arith.constant 0 : i32
    return %c0_i32, %arg1 : i32, i32
  }
  func.func @transform_2(%arg0: i32, %arg1: i32) -> (i32, i32) {
    %c0_i32 = arith.constant 0 : i32
    %c0_i32_0 = arith.constant 0 : i32
    return %c0_i32, %arg1 : i32, i32
  }
  func.func @transform_3(%arg0: i32, %arg1: i32) -> (i32, i32) {
    %c0_i32 = arith.constant 0 : i32
    %c0_i32_0 = arith.constant 0 : i32
    return %c0_i32, %arg1 : i32, i32
  }
  func.func @transform_4(%arg0: i32, %arg1: i32) -> (i32, i32) {
    %c0_i32 = arith.constant 0 : i32
    return %arg0, %arg1 : i32, i32
  }
}

</mosaic_0001>

<bundles_post_ra>
// kernel: matmul_bn_act.1
= control target key start
LH: loop header
LB: loop body
LE: loop exit
PB: predicated region body
PF: predicated region fallthrough
CT: control target
= control target key end

     0   :  { %s2671_s15 = smov 0   ;;  %s2673_s16 = smov 0   ;;  %s3395_s0 = inlined_call_operand.vmem [shape: bf16[2048,27], index: 0, kind: input, shape index: {}]   ;;  %s3396_s1 = inlined_call_operand.vmem [shape: bf16[27,40], index: 1, kind: input, shape index: {}]   ;;  %s3397_s2 = inlined_call_operand.vmem [shape: f32[1,40], index: 2, kind: input, shape index: {}]   ;;  %s3398_s3 = inlined_call_operand.vmem [shape: f32[1,40], index: 3, kind: input, shape index: {}]   ;;  %s3399_s4 = inlined_call_operand.vmem [shape: bf16[2048,40], index: 4, kind: output, shape index: {}]  }
   0x1   :  { %s2675_s17 = smov 0  }
   0x2 LB: > { %s26_s18 = sadd.s32 1, %s2639_s16  ;;  %p1931_p0 = scmp.ge.s32.totalorder %s2643_s17, 1  ;;  %s2643_s17 = sphi %s2675_s17, %s14_s17   ;;  %s2639_s16 = sphi %s2673_s16, %s3401_s16   ;;  %s2635_s15 = sphi %s2671_s15, %s3400_s15  }
   0x3   : > { %p28_p1 = scmp.ge.s32.totalorder %s26_s18, 4  ;;  %p202_p2 = scmp.lt.s32.totalorder %s2643_s17, 5 }
   0x5   : > { %s3403_s18 = smov (%p28_p1, %s26_s18), 0  ;;  %p203_p3 = pnand %p1931_p0, %p202_p2 }
   0x6   : > { %s1932_s21 = sshll.u32 (!%p203_p3), %s2635_s15, 6 }
   0x7   : > { %206 = sbr.rel (%p203_p3) target bundleno = 375 (0x177), region = 36  ;;  %p242_p4 = scmp.lt.s32.totalorder (!%p203_p3), %s1932_s21, 255 }
   0xc   : > { %v2329_v0 = vld [vmem:[%s3396_s1 + $0x8] sm:$0x3f]   ;;  %vm603_vm0 = vcmask 1044480   ;;  %vm604_vm1 = vcmask 1045504   ;;  %v2645_v1 = vmov 65535   ;;  %v2330_v5 = vld [vmem:[%s3396_s1] sm:$0xff]  }
   0xd   : > { %v605_v2 = vsel %vm603_vm0, 4294967295, %v2645_v1  ;;  %s3405_s21 = smov (!%p242_p4, %s1932_s21), 255  ;;  %vm506_vm2 = vcmask 220160   ;;  %v2772_v38 = vld [vmem:[%s3397_s2] ss:$0 sm:$0xff]  ;;  %vm1745_vm3 = vcmask 322560  }
   0xe   : > { %v606_v3 = vsel %vm604_vm1, %v605_v2, 0  ;;  %s1933_s24 = sshll.u32 %s3405_s21, 2  ;;  %v2777_v40 = vld [vmem:[%s3398_s3] ss:$0 sm:$0xff] }
   0xf   : > { %v608_v4 = vand.u32 %v2329_v0, %v606_v3  ;;  %s2703_s27 = scalar_lea.vmem %s3395_s0, %s1933_s24  ;;  %s2942_s8 = scalar_lea.vmem %s3399_s4, %s1933_s24 }
  0x10   : > { %v2331_v6 = vld [vmem:[%s2703_s27] sm:$0xff]   ;;  %v2333_v8 = vld [vmem:[%s2703_s27 + $0x8] sm:$0xff]   ;;  %v2335_v10 = vld [vmem:[%s2703_s27 + $0x10] sm:$0xff]  }
  0x11   : > { %2232 = vmatprep.subr.bf16.mxu0 %v608_v4  ;;  %2300 = vmatprep.subr.bf16.mxu1 %v608_v4  ;;  %v2332_v7 = vld [vmem:[%s2703_s27 + $0x80] sm:$0xff]   ;;  %v2334_v9 = vld [vmem:[%s2703_s27 + $0x88] sm:$0xff]   ;;  %v2336_v11 = vld [vmem:[%s2703_s27 + $0x90] sm:$0xff]  }
  0x12   : > { %2233 = vmatpush3.bf16.msra.mxu0 %v608_v4  ;;  %2302 = vmatpush3.bf16.msra.mxu1 %v608_v4  ;;  %v2337_v12 = vld [vmem:[%s2703_s27 + $0x18] sm:$0xff]   ;;  %v2339_v14 = vld [vmem:[%s2703_s27 + $0x20] sm:$0xff]   ;;  %v2341_v16 = vld [vmem:[%s2703_s27 + $0x28] sm:$0xff]  }
  0x13   : > { %2234 = vmatprep.subr.bf16.mxu0 %v2330_v5  ;;  %2301 = vmatprep.subr.bf16.mxu1 %v2330_v5  ;;  %v2338_v13 = vld [vmem:[%s2703_s27 + $0x98] sm:$0xff]   ;;  %v2340_v15 = vld [vmem:[%s2703_s27 + $0xa0] sm:$0xff]   ;;  %v2342_v17 = vld [vmem:[%s2703_s27 + $0xa8] sm:$0xff]  }
  0x14   : > { %2236 = vmatprep.mubr.msk.bf16.mxu0 %vm506_vm2, %v2331_v6  ;;  %2268 = vmatprep.mubr.msk.bf16.mxu1 %vm506_vm2, %v2332_v7  ;;  %v2343_v18 = vld [vmem:[%s2703_s27 + $0x30] sm:$0xff]   ;;  %v2345_v20 = vld [vmem:[%s2703_s27 + $0x38] sm:$0xff]   ;;  %v2347_v22 = vld [vmem:[%s2703_s27 + $0x40] sm:$0xff]  }
  0x15   : > { %v2344_v19 = vld [vmem:[%s2703_s27 + $0xb0] sm:$0xff]   ;;  %v2346_v21 = vld [vmem:[%s2703_s27 + $0xb8] sm:$0xff]   ;;  %v2348_v23 = vld [vmem:[%s2703_s27 + $0xc0] sm:$0xff]  }
  0x16   : > { %2235 = vmatpush3.bf16.msra.mxu0 %v2330_v5  ;;  %2303 = vmatpush3.bf16.msra.mxu1 %v2330_v5  ;;  %v2349_v24 = vld [vmem:[%s2703_s27 + $0x48] sm:$0xff]   ;;  %v2351_v26 = vld [vmem:[%s2703_s27 + $0x50] sm:$0xff]   ;;  %v2353_v28 = vld [vmem:[%s2703_s27 + $0x58] sm:$0xff]  }
  0x17   : > { %v2350_v25 = vld [vmem:[%s2703_s27 + $0xc8] sm:$0xff]   ;;  %v2352_v27 = vld [vmem:[%s2703_s27 + $0xd0] sm:$0xff]   ;;  %v2354_v29 = vld [vmem:[%s2703_s27 + $0xd8] sm:$0xff]  }
  0x18   : > { %v2355_v30 = vld [vmem:[%s2703_s27 + $0x60] sm:$0xff]   ;;  %v2357_v32 = vld [vmem:[%s2703_s27 + $0x68] sm:$0xff]   ;;  %v2359_v34 = vld [vmem:[%s2703_s27 + $0x70] sm:$0xff]  }
  0x19   : > { %2237 = vmatmul.mubr.msk.bf16.vlgmr.msra.gmra.mxu0 %vm506_vm2, %v2333_v8  ;;  %2269 = vmatmul.mubr.msk.bf16.vlgmr.msra.gmra.mxu1 %vm506_vm2, %v2334_v9  ;;  %v2356_v31 = vld [vmem:[%s2703_s27 + $0xe0] sm:$0xff]   ;;  %v2358_v33 = vld [vmem:[%s2703_s27 + $0xe8] sm:$0xff]   ;;  %v2360_v35 = vld [vmem:[%s2703_s27 + $0xf0] sm:$0xff]  }
  0x1a   : > { %2240 = vmatprep.mubr.msk.bf16.mxu0 %vm506_vm2, %v2335_v10  ;;  %2272 = vmatprep.mubr.msk.bf16.mxu1 %vm506_vm2, %v2336_v11  ;;  %v2361_v36 = vld [vmem:[%s2703_s27 + $0x78] sm:$0xff]  }
  0x1b   : > { %v2362_v37 = vld [vmem:[%s2703_s27 + $0xf8] sm:$0xff]  }
  0x21   : > { %2241 = vmatmul.mubr.msk.bf16.gmra.mxu0 %vm506_vm2, %v2337_v12  ;;  %2273 = vmatmul.mubr.msk.bf16.gmra.mxu1 %vm506_vm2, %v2338_v13 }
  0x22   : > { %2244 = vmatprep.mubr.msk.bf16.mxu0 %vm506_vm2, %v2339_v14  ;;  %2276 = vmatprep.mubr.msk.bf16.mxu1 %vm506_vm2, %v2340_v15 }
  0x29   : > { %2245 = vmatmul.mubr.msk.bf16.gmra.mxu0 %vm506_vm2, %v2341_v16  ;;  %2277 = vmatmul.mubr.msk.bf16.gmra.mxu1 %vm506_vm2, %v2342_v17 }
  0x2a   : > { %2248 = vmatprep.mubr.msk.bf16.mxu0 %vm506_vm2, %v2343_v18  ;;  %2280 = vmatprep.mubr.msk.bf16.mxu1 %vm506_vm2, %v2344_v19 }
  0x31   : > { %2249 = vmatmul.mubr.msk.bf16.gmra.mxu0 %vm506_vm2, %v2345_v20  ;;  %2281 = vmatmul.mubr.msk.bf16.gmra.mxu1 %vm506_vm2, %v2346_v21 }
  0x32   : > { %2252 = vmatprep.mubr.msk.bf16.mxu0 %vm506_vm2, %v2347_v22  ;;  %2284 = vmatprep.mubr.msk.bf16.mxu1 %vm506_vm2, %v2348_v23 }
  0x39   : > { %2253 = vmatmul.mubr.msk.bf16.gmra.mxu0 %vm506_vm2, %v2349_v24  ;;  %2285 = vmatmul.mubr.msk.bf16.gmra.mxu1 %vm506_vm2, %v2350_v25 }
  0x3a   : > { %2256 = vmatprep.mubr.msk.bf16.mxu0 %vm506_vm2, %v2351_v26  ;;  %2288 = vmatprep.mubr.msk.bf16.mxu1 %vm506_vm2, %v2352_v27 }
  0x41   : > { %2257 = vmatmul.mubr.msk.bf16.gmra.mxu0 %vm506_vm2, %v2353_v28  ;;  %2289 = vmatmul.mubr.msk.bf16.gmra.mxu1 %vm506_vm2, %v2354_v29 }
  0x42   : > { %2260 = vmatprep.mubr.msk.bf16.mxu0 %vm506_vm2, %v2355_v30  ;;  %2292 = vmatprep.mubr.msk.bf16.mxu1 %vm506_vm2, %v2356_v31 }
  0x49   : > { %2261 = vmatmul.mubr.msk.bf16.gmra.mxu0 %vm506_vm2, %v2357_v32  ;;  %2293 = vmatmul.mubr.msk.bf16.gmra.mxu1 %vm506_vm2, %v2358_v33 }
  0x4a   : > { %2264 = vmatprep.mubr.msk.bf16.mxu0 %vm506_vm2, %v2359_v34  ;;  %2296 = vmatprep.mubr.msk.bf16.mxu1 %vm506_vm2, %v2360_v35 }
  0x51   : > { %2265 = vmatmul.mubr.msk.bf16.gmra.mxu0 %vm506_vm2, %v2361_v36  ;;  %2297 = vmatmul.mubr.msk.bf16.gmra.mxu1 %vm506_vm2, %v2362_v37 }
  0xd9   : > { %v2238_v39 = vpop.f32.mrf.mxu0  ;;  %v2270_v41 = vpop.f32.mrf.mxu1 }
  0xda   : > { %v908_v42 = vmul.f32 %v2238_v39, %v2772_v38  ;;  %v940_v43 = vmul.f32 %v2270_v41, %v2772_v38 }
  0xdb   : > { %v644_v44 = vpop.f32.mrf.mxu0  ;;  %v772_v45 = vpop.f32.mrf.mxu1 }
  0xdc   : > { %v2782_v46 = vadd.f32 %v2777_v40, %v908_v42  ;;  %v2785_v47 = vadd.f32 %v2777_v40, %v940_v43  ;;  %v906_v48 = vmul.f32 %v2772_v38, %v644_v44  ;;  %v938_v49 = vmul.f32 %v2772_v38, %v772_v45 }
  0xdd   : > { %v2239_v50 = vpop.f32.mrf.mxu0  ;;  %v2271_v51 = vpop.f32.mrf.mxu1 }
  0xde   : > { %v2006_v52 = vmul.f32 -1.442695, %v2782_v46  ;;  %v2038_v53 = vmul.f32 -1.442695, %v2785_v47  ;;  %v2792_v54 = vadd.f32 %v2777_v40, %v906_v48  ;;  %v2795_v55 = vadd.f32 %v2777_v40, %v938_v49 }
  0xdf   : > { %v909_v56 = vmul.f32 %v2239_v50, %v2772_v38  ;;  %v941_v57 = vmul.f32 %v2271_v51, %v2772_v38  ;;  %v647_v58 = vpop.f32.mrf.mxu0  ;;  %v775_v59 = vpop.f32.mrf.mxu1 }
  0xe0   : > { %2363 = vpow2.f32 %v2006_v52  ;;  %v2004_v60 = vmul.f32 -1.442695, %v2792_v54  ;;  %v2036_v61 = vmul.f32 -1.442695, %v2795_v55  ;;  %v907_v62 = vmul.f32 %v2772_v38, %v647_v58 }
  0xe1   : > { %2365 = vpow2.f32 %v2038_v53  ;;  %v2803_v63 = vadd.f32 %v2777_v40, %v909_v56  ;;  %v2806_v0 = vadd.f32 %v2777_v40, %v941_v57  ;;  %v939_v1 = vmul.f32 %v2772_v38, %v775_v59  ;;  %v2242_v2 = vpop.f32.mrf.mxu0  ;;  %v2274_v3 = vpop.f32.mrf.mxu1 }
  0xe2   : > { %2367 = vpow2.f32 %v2004_v60  ;;  %v2810_v4 = vadd.f32 %v2777_v40, %v907_v62  ;;  %v912_v5 = vmul.f32 %v2242_v2, %v2772_v38  ;;  %v944_v6 = vmul.f32 %v2274_v3, %v2772_v38 }
  0xe3   : > { %2369 = vpow2.f32 %v2036_v61  ;;  %v2007_v7 = vmul.f32 -1.442695, %v2803_v63  ;;  %v2039_v8 = vmul.f32 -1.442695, %v2806_v0  ;;  %v2817_v9 = vadd.f32 %v2777_v40, %v939_v1  ;;  %v660_v10 = vpop.f32.mrf.mxu0  ;;  %v788_v11 = vpop.f32.mrf.mxu1 }
  0xe4   : > { %v2005_v12 = vmul.f32 -1.442695, %v2810_v4  ;;  %v2821_v13 = vadd.f32 %v2777_v40, %v912_v5  ;;  %v2824_v14 = vadd.f32 %v2777_v40, %v944_v6  ;;  %v910_v15 = vmul.f32 %v2772_v38, %v660_v10 }
  0xe5   : > { %2371 = vpow2.f32 %v2007_v7  ;;  %v2037_v16 = vmul.f32 -1.442695, %v2817_v9  ;;  %v942_v17 = vmul.f32 %v2772_v38, %v788_v11  ;;  %v2243_v18 = vpop.f32.mrf.mxu0  ;;  %v2275_v19 = vpop.f32.mrf.mxu1 }
  0xe6   : > { %2373 = vpow2.f32 %v2039_v8  ;;  %v2010_v20 = vmul.f32 -1.442695, %v2821_v13  ;;  %v2042_v21 = vmul.f32 -1.442695, %v2824_v14  ;;  %v2832_v22 = vadd.f32 %v2777_v40, %v910_v15 }
  0xe7   : > { %2375 = vpow2.f32 %v2005_v12  ;;  %v2835_v23 = vadd.f32 %v2777_v40, %v942_v17  ;;  %v913_v24 = vmul.f32 %v2243_v18, %v2772_v38  ;;  %v945_v25 = vmul.f32 %v2275_v19, %v2772_v38  ;;  %v663_v26 = vpop.f32.mrf.mxu0  ;;  %v791_v27 = vpop.f32.mrf.mxu1 }
  0xe8   : > { %2377 = vpow2.f32 %v2037_v16  ;;  %v2008_v28 = vmul.f32 -1.442695, %v2832_v22  ;;  %v911_v29 = vmul.f32 %v2772_v38, %v663_v26  ;;  %v943_v30 = vmul.f32 %v2772_v38, %v791_v27 }
  0xe9   : > { %2379 = vpow2.f32 %v2010_v20  ;;  %v2040_v31 = vmul.f32 -1.442695, %v2835_v23  ;;  %v2844_v32 = vadd.f32 %v2777_v40, %v913_v24  ;;  %v2847_v33 = vadd.f32 %v2777_v40, %v945_v25  ;;  %v2246_v34 = vpop.f32.mrf.mxu0  ;;  %v2278_v35 = vpop.f32.mrf.mxu1 }
  0xea   : > { %2381 = vpow2.f32 %v2042_v21  ;;  %v2850_v36 = vadd.f32 %v2777_v40, %v911_v29  ;;  %v916_v37 = vmul.f32 %v2246_v34, %v2772_v38  ;;  %v948_v42 = vmul.f32 %v2278_v35, %v2772_v38 }
  0xeb   : > { %2383 = vpow2.f32 %v2008_v28  ;;  %v2011_v39 = vmul.f32 -1.442695, %v2844_v32  ;;  %v2043_v41 = vmul.f32 -1.442695, %v2847_v33  ;;  %v676_v43 = vpop.f32.mrf.mxu0  ;;  %v804_v44 = vpop.f32.mrf.mxu1  ;;  %v2858_v48 = vadd.f32 %v2777_v40, %v943_v30 }
  0xec   : > { %2385 = vpow2.f32 %v2040_v31  ;;  %v2009_v45 = vmul.f32 -1.442695, %v2850_v36  ;;  %v914_v50 = vmul.f32 %v2772_v38, %v676_v43  ;;  %v2862_v57 = vadd.f32 %v2777_v40, %v916_v37 }
  0xed   : > { %v2364_v49 = vpop.eup %2363  ;;  %2387 = vpow2.f32 %v2011_v39  ;;  %v2247_v51 = vpop.f32.mrf.mxu0  ;;  %v946_v58 = vmul.f32 %v2772_v38, %v804_v44  ;;  %v2866_v61 = vadd.f32 %v2777_v40, %v948_v42  ;;  %v2041_v5 = vmul.f32 -1.442695, %v2858_v48 }
  0xee   : > { %v2279_v52 = vpop.f32.mrf.mxu1  ;;  %v2366_v53 = vpop.eup %2365  ;;  %v1235_v56 = vadd.f32 1.0, %v2364_v49  ;;  %2389 = vpow2.f32 %v2043_v41  ;;  %v917_v6 = vmul.f32 %v2247_v51, %v2772_v38  ;;  %v2871_v8 = vadd.f32 %v2777_v40, %v914_v50 }
  0xef   : > { %v2368_v59 = vpop.eup %2367  ;;  %v1267_v60 = vadd.f32 1.0, %v2366_v53  ;;  %2391 = vpow2.f32 %v2009_v45  ;;  %v679_v62 = vpop.f32.mrf.mxu0  ;;  %v2874_v12 = vmul.f32 -1.442695, %v2862_v57  ;;  %v2877_v15 = vadd.f32 %v2777_v40, %v946_v58 }
  0xf0   : > { %v807_v1 = vpop.f32.mrf.mxu1  ;;  %v2370_v2 = vpop.eup %2369  ;;  %2393 = vrcp.f32 %v1235_v56  ;;  %v1233_v3 = vadd.f32 1.0, %v2368_v59  ;;  %v949_v16 = vmul.f32 %v2279_v52, %v2772_v38  ;;  %v2881_v19 = vmul.f32 -1.442695, %v2866_v61 }
  0xf1   : > { %2395 = vrcp.f32 %v1267_v60  ;;  %v1265_v7 = vadd.f32 1.0, %v2370_v2  ;;  %v2250_v10 = vpop.f32.mrf.mxu0  ;;  %v915_v20 = vmul.f32 %v2772_v38, %v679_v62  ;;  %v2885_v26 = vadd.f32 %v2777_v40, %v917_v6 }
  0xf2   : > { %v2372_v11 = vpop.eup %2371  ;;  %2397 = vrcp.f32 %v1233_v3  ;;  %v2282_v21 = vpop.f32.mrf.mxu1  ;;  %v947_v27 = vmul.f32 %v2772_v38, %v807_v1  ;;  %v2889_v31 = vmul.f32 -1.442695, %v2871_v8  ;;  %v920_v34 = vmul.f32 %v2250_v10, %v2772_v38 }
  0xf3   : > { %v2374_v17 = vpop.eup %2373  ;;  %2399 = vrcp.f32 %v1265_v7  ;;  %v1236_v18 = vadd.f32 1.0, %v2372_v11  ;;  %v692_v28 = vpop.f32.mrf.mxu0  ;;  %v2893_v39 = vmul.f32 -1.442695, %v2877_v15  ;;  %v2896_v41 = vadd.f32 %v2777_v40, %v949_v16 }
  0xf4   : > { %v2376_v24 = vpop.eup %2375  ;;  %v1268_v25 = vadd.f32 1.0, %v2374_v17  ;;  %2401 = vpow2.f32 %v2041_v5  ;;  %v2899_v44 = vadd.f32 %v2777_v40, %v915_v20  ;;  %v952_v45 = vmul.f32 %v2282_v21, %v2772_v38  ;;  %v820_v49 = vpop.f32.mrf.mxu1 }
  0xf5   : > { %v2378_v29 = vpop.eup %2377  ;;  %2403 = vrcp.f32 %v1236_v18  ;;  %v1234_v30 = vadd.f32 1.0, %v2376_v24  ;;  %v2903_v52 = vmul.f32 -1.442695, %v2885_v26  ;;  %v2906_v53 = vadd.f32 %v2777_v40, %v947_v27  ;;  %v2251_v56 = vpop.f32.mrf.mxu0 }
  0xf6   : > { %v2380_v35 = vpop.eup %2379  ;;  %2405 = vrcp.f32 %v1268_v25  ;;  %v1266_v37 = vadd.f32 1.0, %v2378_v29  ;;  %v2909_v60 = vadd.f32 %v2777_v40, %v920_v34  ;;  %v918_v62 = vmul.f32 %v2772_v38, %v692_v28  ;;  %v2283_v16 = vpop.f32.mrf.mxu1 }
  0xf7   : > { %v2382_v42 = vpop.eup %2381  ;;  %2407 = vrcp.f32 %v1234_v30  ;;  %v1239_v43 = vadd.f32 1.0, %v2380_v35  ;;  %v2913_v3 = vmul.f32 -1.442695, %v2896_v41  ;;  %v2916_v5 = vadd.f32 %v2777_v40, %v952_v45  ;;  %v695_v24 = vpop.f32.mrf.mxu0 }
  0xf8   : > { %v2384_v50 = vpop.eup %2383  ;;  %2409 = vrcp.f32 %v1266_v37  ;;  %v1271_v51 = vadd.f32 1.0, %v2382_v42  ;;  %v2919_v10 = vmul.f32 -1.442695, %v2899_v44  ;;  %v950_v11 = vmul.f32 %v2772_v38, %v820_v49  ;;  %v823_v49 = vpop.f32.mrf.mxu1 }
  0xf9   : > { %v2386_v58 = vpop.eup %2385  ;;  %2411 = vrcp.f32 %v1239_v43  ;;  %v1237_v59 = vadd.f32 1.0, %v2384_v50  ;;  %v2923_v20 = vmul.f32 -1.442695, %v2906_v53  ;;  %v921_v21 = vmul.f32 %v2251_v56, %v2772_v38 }
  0xfa   : > { %v2388_v1 = vpop.eup %2387  ;;  %2413 = vrcp.f32 %v1271_v51  ;;  %v1269_v2 = vadd.f32 1.0, %v2386_v58  ;;  %v2927_v28 = vmul.f32 -1.442695, %v2909_v60  ;;  %v2930_v29 = vadd.f32 %v2777_v40, %v918_v62 }
  0xfb   : > { %v2390_v6 = vpop.eup %2389  ;;  %2415 = vrcp.f32 %v1237_v59  ;;  %v1240_v7 = vadd.f32 1.0, %v2388_v1  ;;  %v2934_v35 = vmul.f32 -1.442695, %v2916_v5  ;;  %v953_v37 = vmul.f32 %v2283_v16, %v2772_v38 }
  0xfc   : > { %v2392_v17 = vpop.eup %2391  ;;  %2417 = vrcp.f32 %v1269_v2  ;;  %v1272_v18 = vadd.f32 1.0, %v2390_v6  ;;  %v2946_v45 = vadd.f32 %v2777_v40, %v950_v11  ;;  %v2952_v58 = vadd.f32 %v2777_v40, %v921_v21  ;;  %v2254_v2 = vpop.f32.mrf.mxu0 }
  0xfd   : > { %v2394_v25 = vpop.eup %2393  ;;  %2419 = vrcp.f32 %v1240_v7  ;;  %v1238_v27 = vadd.f32 1.0, %v2392_v17  ;;  %v2957_v1 = vmul.f32 -1.442695, %v2930_v29  ;;  %v2286_v17 = vpop.f32.mrf.mxu1 }
  0xfe   : > { %v2396_v30 = vpop.eup %2395  ;;  %v1427_v34 = vmul.f32 %v2394_v25, %v2782_v46  ;;  %2421 = vrcp.f32 %v1272_v18  ;;  %v919_v46 = vmul.f32 %v2772_v38, %v695_v24  ;;  %v2048_v21 = vmul.f32 -1.442695, %v2946_v45 }
  0xff   : > { %v2398_v42 = vpop.eup %2397  ;;  %v1459_v43 = vmul.f32 %v2396_v30, %v2785_v47  ;;  %2423 = vrcp.f32 %v1238_v27  ;;  %v2019_v24 = vmul.f32 -1.442695, %v2952_v58  ;;  %v951_v27 = vmul.f32 %v2772_v38, %v823_v49  ;;  %v708_v30 = vpop.f32.mrf.mxu0 }
 0x100   : > { %v2400_v50 = vpop.eup %2399  ;;  %v2136_v51 = vpack.c.bf16 %v1427_v34, %v1427_v34  ;;  %v1425_v56 = vmul.f32 %v2398_v42, %v2792_v54  ;;  %2425 = vpow2.f32 %v2874_v12  ;;  %v2963_v12 = vadd.f32 %v2777_v40, %v953_v37  ;;  %v836_v49 = vpop.f32.mrf.mxu1 }
 0x101   : > { %v2402_v59 = vpop.eup %2401  ;;  %v2168_v47 = vpack.c.bf16 %v1459_v43, %v1459_v43  ;;  %v1457_v62 = vmul.f32 %v2400_v50, %v2795_v55  ;;  %2427 = vpow2.f32 %v2881_v19  ;;  %v2970_v16 = vadd.f32 %v2777_v40, %v919_v46 }
 0x102   : > { %v2404_v6 = vpop.eup %2403  ;;  %1748 = vst.msk [vmem:[%s2942_s8 + $0x8] sm:$0xf] %vm1745_vm3, %v2136_v51  ;;  %v2134_v54 = vpack.c.bf16 %v1425_v56, %v1425_v56  ;;  %v1270_v7 = vadd.f32 1.0, %v2402_v59  ;;  %2429 = vpow2.f32 %v2889_v31  ;;  %v2051_v42 = vmul.f32 -1.442695, %v2963_v12 }
 0x103   : > { %v2406_v11 = vpop.eup %2405  ;;  %1780 = vst.msk [vmem:[%s2942_s8 + $0x88] sm:$0xf] %vm1745_vm3, %v2168_v47  ;;  %v2166_v55 = vpack.c.bf16 %v1457_v62, %v1457_v62  ;;  %v1428_v19 = vmul.f32 %v2404_v6, %v2803_v63  ;;  %2431 = vpow2.f32 %v2893_v39  ;;  %v924_v51 = vmul.f32 %v2254_v2, %v2772_v38  ;;  %v2255_v47 = vpop.f32.mrf.mxu0 }
 0x104   : > { %v2408_v18 = vpop.eup %2407  ;;  %1746 = vst.msk [vmem:[%s2942_s8] sm:$0xf] %vm1745_vm3, %v2134_v54  ;;  %v1460_v31 = vmul.f32 %v2406_v11, %v2806_v0  ;;  %2433 = vrcp.f32 %v1270_v7  ;;  %v3000_v59 = vadd.f32 %v2777_v40, %v951_v27  ;;  %v956_v2 = vmul.f32 %v2286_v17, %v2772_v38  ;;  %v2287_v7 = vpop.f32.mrf.mxu1 }
 0x105   : > { %v2410_v25 = vpop.eup %2409  ;;  %1778 = vst.msk [vmem:[%s2942_s8 + $0x80] sm:$0xf] %vm1745_vm3, %v2166_v55  ;;  %v2137_v63 = vpack.c.bf16 %v1428_v19, %v1428_v19  ;;  %v1426_v39 = vmul.f32 %v2408_v18, %v2810_v4  ;;  %2435 = vpow2.f32 %v2903_v52  ;;  %v2017_v52 = vmul.f32 -1.442695, %v2970_v16  ;;  %v711_v18 = vpop.f32.mrf.mxu0 }
 0x106   : > { %v2412_v34 = vpop.eup %2411  ;;  %v2169_v0 = vpack.c.bf16 %v1460_v31, %v1460_v31  ;;  %v1458_v37 = vmul.f32 %v2410_v25, %v2817_v9  ;;  %2437 = vpow2.f32 %v2913_v3  ;;  %v922_v54 = vmul.f32 %v2772_v38, %v708_v30  ;;  %v839_v27 = vpop.f32.mrf.mxu1 }
 0x107   : > { %v2414_v43 = vpop.eup %2413  ;;  %1749 = vst.msk [vmem:[%s2942_s8 + $0xc] sm:$0xf] %vm1745_vm3, %v2137_v63  ;;  %v2135_v46 = vpack.c.bf16 %v1426_v39, %v1426_v39  ;;  %v1431_v4 = vmul.f32 %v2412_v34, %v2821_v13  ;;  %2439 = vpow2.f32 %v2919_v10  ;;  %v3016_v55 = vadd.f32 %v2777_v40, %v924_v51 }
 0x108   : > { %v2416_v50 = vpop.eup %2415  ;;  %1781 = vst.msk [vmem:[%s2942_s8 + $0x8c] sm:$0xf] %vm1745_vm3, %v2169_v0  ;;  %v2167_v9 = vpack.c.bf16 %v1458_v37, %v1458_v37  ;;  %v1463_v3 = vmul.f32 %v2414_v43, %v2824_v14  ;;  %2441 = vpow2.f32 %v2923_v20  ;;  %v954_v17 = vmul.f32 %v2772_v38, %v836_v49 }
 0x109   : > { %v2418_v56 = vpop.eup %2417  ;;  %1747 = vst.msk [vmem:[%s2942_s8 + $0x4] sm:$0xf] %vm1745_vm3, %v2135_v46  ;;  %v2140_v13 = vpack.c.bf16 %v1431_v4, %v1431_v4  ;;  %v1429_v10 = vmul.f32 %v2416_v50, %v2832_v22  ;;  %2443 = vpow2.f32 %v2927_v28  ;;  %v3025_v25 = vadd.f32 %v2777_v40, %v956_v2  ;;  %v2258_v4 = vpop.f32.mrf.mxu0 }
 0x10a   : > { %v2420_v62 = vpop.eup %2419  ;;  %1779 = vst.msk [vmem:[%s2942_s8 + $0x84] sm:$0xf] %vm1745_vm3, %v2167_v9  ;;  %v2172_v14 = vpack.c.bf16 %v1463_v3, %v1463_v3  ;;  %v1461_v20 = vmul.f32 %v2418_v56, %v2835_v23  ;;  %2445 = vpow2.f32 %v2934_v35  ;;  %v2049_v0 = vmul.f32 -1.442695, %v3000_v59 }
 0x10b   : > { %v2422_v6 = vpop.eup %2421  ;;  %1752 = vst.msk [vmem:[%s2942_s8 + $0x18] sm:$0xf] %vm1745_vm3, %v2140_v13  ;;  %v2138_v22 = vpack.c.bf16 %v1429_v10, %v1429_v10  ;;  %v1432_v28 = vmul.f32 %v2420_v62, %v2844_v32  ;;  %2447 = vpow2.f32 %v2957_v1  ;;  %v3038_v43 = vmul.f32 -1.442695, %v3016_v55  ;;  %v2290_v10 = vpop.f32.mrf.mxu1 }
 0x10c   : > { %v2424_v11 = vpop.eup %2423  ;;  %1784 = vst.msk [vmem:[%s2942_s8 + $0x98] sm:$0xf] %vm1745_vm3, %v2172_v14  ;;  %v2170_v23 = vpack.c.bf16 %v1461_v20, %v1461_v20  ;;  %v1464_v35 = vmul.f32 %v2422_v6, %v2847_v33  ;;  %2449 = vpow2.f32 %v2048_v21  ;;  %v3041_v46 = vadd.f32 %v2777_v40, %v954_v17 }
 0x10d   : > { %v2426_v19 = vpop.eup %2425  ;;  %1750 = vst.msk [vmem:[%s2942_s8 + $0x10] sm:$0xf] %vm1745_vm3, %v2138_v22  ;;  %v2141_v32 = vpack.c.bf16 %v1432_v28, %v1432_v28  ;;  %v1430_v1 = vmul.f32 %v2424_v11, %v2850_v36  ;;  %2451 = vpow2.f32 %v2019_v24  ;;  %v3030_v24 = vadd.f32 %v2777_v40, %v922_v54  ;;  %v724_v28 = vpop.f32.mrf.mxu0 }
 0x10e   : > { %v2428_v31 = vpop.eup %2427  ;;  %1782 = vst.msk [vmem:[%s2942_s8 + $0x90] sm:$0xf] %vm1745_vm3, %v2170_v23  ;;  %v2173_v33 = vpack.c.bf16 %v1464_v35, %v1464_v35  ;;  %v1243_v21 = vadd.f32 1.0, %v2426_v19  ;;  %2453 = vpow2.f32 %v2051_v42  ;;  %v3045_v50 = vmul.f32 -1.442695, %v3025_v25  ;;  %v852_v17 = vpop.f32.mrf.mxu1 }
 0x10f   : > { %v2430_v63 = vpop.eup %2429  ;;  %1753 = vst.msk [vmem:[%s2942_s8 + $0x1c] sm:$0xf] %vm1745_vm3, %v2141_v32  ;;  %v2139_v39 = vpack.c.bf16 %v1430_v1, %v1430_v1  ;;  %v1275_v36 = vadd.f32 1.0, %v2428_v31  ;;  %2455 = vpow2.f32 %v2017_v52  ;;  %v925_v9 = vmul.f32 %v2255_v47, %v2772_v38 }
 0x110   : > { %v2432_v30 = vpop.eup %2431  ;;  %1785 = vst.msk [vmem:[%s2942_s8 + $0x9c] sm:$0xf] %vm1745_vm3, %v2173_v33  ;;  %2457 = vrcp.f32 %v1243_v21  ;;  %v1241_v34 = vadd.f32 1.0, %v2430_v63  ;;  %v3049_v56 = vmul.f32 -1.442695, %v3030_v24  ;;  %v957_v13 = vmul.f32 %v2287_v7, %v2772_v38 }
 0x111   : > { %v2434_v37 = vpop.eup %2433  ;;  %1751 = vst.msk [vmem:[%s2942_s8 + $0x14] sm:$0xf] %vm1745_vm3, %v2139_v39  ;;  %2459 = vrcp.f32 %v1275_v36  ;;  %v1273_v42 = vadd.f32 1.0, %v2432_v30  ;;  %v3054_v47 = vmul.f32 -1.442695, %v3041_v46  ;;  %v955_v22 = vmul.f32 %v2772_v38, %v839_v27 }
 0x112   : > { %v2436_v52 = vpop.eup %2435  ;;  %v1462_v49 = vmul.f32 %v2434_v37, %v2858_v48  ;;  %2461 = vrcp.f32 %v1241_v34  ;;  %v923_v48 = vmul.f32 %v2772_v38, %v711_v18  ;;  %v3060_v11 = vadd.f32 %v2777_v40, %v925_v9 }
 0x113   : > { %v2438_v3 = vpop.eup %2437  ;;  %2463 = vrcp.f32 %v1273_v42  ;;  %v1244_v51 = vadd.f32 1.0, %v2436_v52  ;;  %v928_v23 = vmul.f32 %v2258_v4, %v2772_v38  ;;  %v3064_v32 = vadd.f32 %v2777_v40, %v957_v13  ;;  %v2259_v42 = vpop.f32.mrf.mxu0 }
 0x114   : > { %v2440_v62 = vpop.eup %2439  ;;  %v2171_v14 = vpack.c.bf16 %v1462_v49, %v1462_v49  ;;  %v1276_v20 = vadd.f32 1.0, %v2438_v3  ;;  %2465 = vpow2.f32 %v2049_v0  ;;  %v960_v1 = vmul.f32 %v2290_v10, %v2772_v38 }
 0x115   : > { %v2442_v2 = vpop.eup %2441  ;;  %2467 = vrcp.f32 %v1244_v51  ;;  %v1242_v6 = vadd.f32 1.0, %v2440_v62  ;;  %v3068_v33 = vadd.f32 %v2777_v40, %v923_v48  ;;  %v926_v21 = vmul.f32 %v2772_v38, %v724_v28  ;;  %v2291_v62 = vpop.f32.mrf.mxu1 }
 0x116   : > { %v2444_v54 = vpop.eup %2443  ;;  %1783 = vst.msk [vmem:[%s2942_s8 + $0x94] sm:$0xf] %vm1745_vm3, %v2171_v14  ;;  %2469 = vrcp.f32 %v1276_v20  ;;  %v1274_v7 = vadd.f32 1.0, %v2442_v2  ;;  %v3072_v36 = vadd.f32 %v2777_v40, %v955_v22  ;;  %v3075_v27 = vadd.f32 %v2777_v40, %v928_v23 }
 0x117   : > { %v2446_v35 = vpop.eup %2445  ;;  %2471 = vrcp.f32 %v1242_v6  ;;  %v1247_v19 = vadd.f32 1.0, %v2444_v54  ;;  %v3078_v0 = vmul.f32 -1.442695, %v3060_v11  ;;  %v958_v37 = vmul.f32 %v2772_v38, %v852_v17 }
 0x118   : > { %v2448_v18 = vpop.eup %2447  ;;  %2473 = vrcp.f32 %v1274_v7  ;;  %v1279_v31 = vadd.f32 1.0, %v2446_v35  ;;  %v3082_v49 = vmul.f32 -1.442695, %v3064_v32  ;;  %v3085_v9 = vadd.f32 %v2777_v40, %v960_v1  ;;  %v727_v7 = vpop.f32.mrf.mxu0 }
 0x119   : > { %v2450_v63 = vpop.eup %2449  ;;  %2475 = vrcp.f32 %v1247_v19  ;;  %v1245_v39 = vadd.f32 1.0, %v2448_v18  ;;  %v3088_v13 = vmul.f32 -1.442695, %v3068_v33  ;;  %v3091_v10 = vadd.f32 %v2777_v40, %v926_v21  ;;  %v855_v21 = vpop.f32.mrf.mxu1 }
 0x11a   : > { %v2452_v30 = vpop.eup %2451  ;;  %2477 = vrcp.f32 %v1279_v31  ;;  %v1277_v34 = vadd.f32 1.0, %v2450_v63  ;;  %v3094_v48 = vmul.f32 -1.442695, %v3072_v36  ;;  %v3097_v2 = vmul.f32 -1.442695, %v3075_v27 }
 0x11b   : > { %v2454_v4 = vpop.eup %2453  ;;  %2479 = vrcp.f32 %v1245_v39  ;;  %v1248_v52 = vadd.f32 1.0, %v2452_v30  ;;  %v3101_v28 = vadd.f32 %v2777_v40, %v958_v37  ;;  %v929_v54 = vmul.f32 %v2259_v42, %v2772_v38 }
 0x11c   : > { %v2456_v3 = vpop.eup %2455  ;;  %2481 = vrcp.f32 %v1277_v34  ;;  %v1280_v51 = vadd.f32 1.0, %v2454_v4  ;;  %v3106_v19 = vmul.f32 -1.442695, %v3085_v9  ;;  %v961_v1 = vmul.f32 %v2291_v62, %v2772_v38 }
 0x11d   : > { %v2458_v14 = vpop.eup %2457  ;;  %2483 = vrcp.f32 %v1248_v52  ;;  %v1246_v20 = vadd.f32 1.0, %v2456_v3  ;;  %v3112_v31 = vmul.f32 -1.442695, %v3091_v10  ;;  %v927_v30 = vmul.f32 %v2772_v38, %v727_v7  ;;  %v2262_v52 = vpop.f32.mrf.mxu0 }
 0x11e   : > { %v2460_v6 = vpop.eup %2459  ;;  %v1435_v22 = vmul.f32 %v2458_v14, %v2862_v57  ;;  %2485 = vrcp.f32 %v1280_v51  ;;  %v3128_v4 = vadd.f32 %v2777_v40, %v961_v1  ;;  %v2056_v51 = vmul.f32 -1.442695, %v3101_v28  ;;  %v2294_v14 = vpop.f32.mrf.mxu1 }
 0x11f   : > { %v2462_v23 = vpop.eup %2461  ;;  %v1467_v35 = vmul.f32 %v2460_v6, %v2866_v61  ;;  %2487 = vrcp.f32 %v1246_v20  ;;  %v959_v62 = vmul.f32 %v2772_v38, %v855_v21  ;;  %v3140_v6 = vadd.f32 %v2777_v40, %v927_v30  ;;  %v740_v1 = vpop.f32.mrf.mxu0 }
 0x120   : > { %v2464_v17 = vpop.eup %2463  ;;  %v2144_v18 = vpack.c.bf16 %v1435_v22, %v1435_v22  ;;  %v1433_v57 = vmul.f32 %v2462_v23, %v2871_v8  ;;  %2489 = vpow2.f32 %v3038_v43  ;;  %v3121_v43 = vadd.f32 %v2777_v40, %v929_v54 }
 0x121   : > { %v2466_v63 = vpop.eup %2465  ;;  %v2176_v61 = vpack.c.bf16 %v1467_v35, %v1467_v35  ;;  %v1465_v39 = vmul.f32 %v2464_v17, %v2877_v15  ;;  %2491 = vpow2.f32 %v3045_v50 }
 0x122   : > { %v2468_v34 = vpop.eup %2467  ;;  %1756 = vst.msk [vmem:[%s2942_s8 + $0x28] sm:$0xf] %vm1745_vm3, %v2144_v18  ;;  %v2142_v8 = vpack.c.bf16 %v1433_v57, %v1433_v57  ;;  %v1278_v37 = vadd.f32 1.0, %v2466_v63  ;;  %2493 = vpow2.f32 %v3049_v56  ;;  %v2027_v7 = vmul.f32 -1.442695, %v3121_v43  ;;  %v868_v57 = vpop.f32.mrf.mxu1 }
 0x123   : > { %v2470_v42 = vpop.eup %2469  ;;  %1788 = vst.msk [vmem:[%s2942_s8 + $0xa8] sm:$0xf] %vm1745_vm3, %v2176_v61  ;;  %v2174_v15 = vpack.c.bf16 %v1465_v39, %v1465_v39  ;;  %v1436_v50 = vmul.f32 %v2468_v34, %v2885_v26  ;;  %2495 = vpow2.f32 %v3054_v47  ;;  %v932_v18 = vmul.f32 %v2262_v52, %v2772_v38 }
 0x124   : > { %v2472_v3 = vpop.eup %2471  ;;  %1754 = vst.msk [vmem:[%s2942_s8 + $0x20] sm:$0xf] %vm1745_vm3, %v2142_v8  ;;  %v1468_v56 = vmul.f32 %v2470_v42, %v2896_v41  ;;  %2497 = vrcp.f32 %v1278_v37  ;;  %v964_v63 = vmul.f32 %v2294_v14, %v2772_v38  ;;  %v2025_v39 = vmul.f32 -1.442695, %v3140_v6  ;;  %v2263_v8 = vpop.f32.mrf.mxu0 }
 0x125   : > { %v2474_v20 = vpop.eup %2473  ;;  %1786 = vst.msk [vmem:[%s2942_s8 + $0xa0] sm:$0xf] %vm1745_vm3, %v2174_v15  ;;  %v2145_v26 = vpack.c.bf16 %v1436_v50, %v1436_v50  ;;  %v1434_v47 = vmul.f32 %v2472_v3, %v2899_v44  ;;  %2499 = vpow2.f32 %v3078_v0  ;;  %v2059_v0 = vmul.f32 -1.442695, %v3128_v4  ;;  %v2295_v15 = vpop.f32.mrf.mxu1 }
 0x126   : > { %v2476_v41 = vpop.eup %2475  ;;  %v2177_v22 = vpack.c.bf16 %v1468_v56, %v1468_v56  ;;  %v1466_v54 = vmul.f32 %v2474_v20, %v2906_v53  ;;  %2501 = vpow2.f32 %v3082_v49  ;;  %v3170_v34 = vadd.f32 %v2777_v40, %v959_v62 }
 0x127   : > { %v2478_v23 = vpop.eup %2477  ;;  %1757 = vst.msk [vmem:[%s2942_s8 + $0x2c] sm:$0xf] %vm1745_vm3, %v2145_v26  ;;  %v2143_v35 = vpack.c.bf16 %v1434_v47, %v1434_v47  ;;  %v1439_v44 = vmul.f32 %v2476_v41, %v2909_v60  ;;  %2503 = vpow2.f32 %v3088_v13  ;;  %v3176_v42 = vadd.f32 %v2777_v40, %v932_v18  ;;  %v743_v26 = vpop.f32.mrf.mxu0 }
 0x128   : > { %v2480_v17 = vpop.eup %2479  ;;  %1789 = vst.msk [vmem:[%s2942_s8 + $0xac] sm:$0xf] %vm1745_vm3, %v2177_v22  ;;  %v2175_v53 = vpack.c.bf16 %v1466_v54, %v1466_v54  ;;  %v1471_v49 = vmul.f32 %v2478_v23, %v2916_v5  ;;  %2505 = vpow2.f32 %v3094_v48  ;;  %v3182_v52 = vadd.f32 %v2777_v40, %v964_v63  ;;  %v871_v54 = vpop.f32.mrf.mxu1 }
 0x129   : > { %v2482_v21 = vpop.eup %2481  ;;  %1755 = vst.msk [vmem:[%s2942_s8 + $0x24] sm:$0xf] %vm1745_vm3, %v2143_v35  ;;  %v2148_v60 = vpack.c.bf16 %v1439_v44, %v1439_v44  ;;  %v1437_v13 = vmul.f32 %v2480_v17, %v2930_v29  ;;  %2507 = vpow2.f32 %v3097_v2  ;;  %v2057_v22 = vmul.f32 -1.442695, %v3170_v34 }
 0x12a   : > { %v2484_v61 = vpop.eup %2483  ;;  %1787 = vst.msk [vmem:[%s2942_s8 + $0xa4] sm:$0xf] %vm1745_vm3, %v2175_v53  ;;  %v2180_v5 = vpack.c.bf16 %v1471_v49, %v1471_v49  ;;  %v1469_v48 = vmul.f32 %v2482_v21, %v2946_v45  ;;  %2509 = vpow2.f32 %v3106_v19  ;;  %v3203_v49 = vmul.f32 -1.442695, %v3182_v52  ;;  %v2298_v63 = vpop.f32.mrf.mxu1 }
 0x12b   : > { %v2486_v30 = vpop.eup %2485  ;;  %1760 = vst.msk [vmem:[%s2942_s8 + $0x38] sm:$0xf] %vm1745_vm3, %v2148_v60  ;;  %v2146_v29 = vpack.c.bf16 %v1437_v13, %v1437_v13  ;;  %v1440_v2 = vmul.f32 %v2484_v61, %v2952_v58  ;;  %2511 = vpow2.f32 %v3112_v31  ;;  %v933_v13 = vmul.f32 %v2263_v8, %v2772_v38 }
 0x12c   : > { %v2488_v37 = vpop.eup %2487  ;;  %1792 = vst.msk [vmem:[%s2942_s8 + $0xb8] sm:$0xf] %vm1745_vm3, %v2180_v5  ;;  %v2178_v45 = vpack.c.bf16 %v1469_v48, %v1469_v48  ;;  %v1472_v19 = vmul.f32 %v2486_v30, %v2963_v12  ;;  %2513 = vpow2.f32 %v2056_v51  ;;  %v930_v51 = vmul.f32 %v2772_v38, %v740_v1 }
 0x12d   : > { %v2490_v58 = vpop.eup %2489  ;;  %1758 = vst.msk [vmem:[%s2942_s8 + $0x30] sm:$0xf] %vm1745_vm3, %v2146_v29  ;;  %v2149_v31 = vpack.c.bf16 %v1440_v2, %v1440_v2  ;;  %v1438_v50 = vmul.f32 %v2488_v37, %v2970_v16  ;;  %2515 = vpow2.f32 %v2027_v7  ;;  %v962_v16 = vmul.f32 %v2772_v38, %v868_v57  ;;  %v2266_v57 = vpop.f32.mrf.mxu0  ;;  %v3219_v2 = vld [vmem:[%s3397_s2] ss:$0 sm:$0xff] }
 0x12e   : > { %v2492_v3 = vpop.eup %2491  ;;  %1790 = vst.msk [vmem:[%s2942_s8 + $0xb0] sm:$0xf] %vm1745_vm3, %v2178_v45  ;;  %v2181_v12 = vpack.c.bf16 %v1472_v19, %v1472_v19  ;;  %v1251_v56 = vadd.f32 1.0, %v2490_v58  ;;  %2517 = vpow2.f32 %v2059_v0  ;;  %v3197_v0 = vmul.f32 -1.442695, %v3176_v42 }
 0x12f   : > { %v2494_v62 = vpop.eup %2493  ;;  %1761 = vst.msk [vmem:[%s2942_s8 + $0x3c] sm:$0xf] %vm1745_vm3, %v2149_v31  ;;  %v2147_v14 = vpack.c.bf16 %v1438_v50, %v1438_v50  ;;  %v1283_v20 = vadd.f32 1.0, %v2492_v3  ;;  %2519 = vpow2.f32 %v2025_v39  ;;  %v3200_v1 = vadd.f32 %v2777_v40, %v930_v51  ;;  %v3229_v50 = vld [vmem:[%s3398_s3] ss:$0 sm:$0xff] }
 0x130   : > { %v2496_v47 = vpop.eup %2495  ;;  %1793 = vst.msk [vmem:[%s2942_s8 + $0xbc] sm:$0xf] %vm1745_vm3, %v2181_v12  ;;  %2521 = vrcp.f32 %v1251_v56  ;;  %v1249_v41 = vadd.f32 1.0, %v2494_v62  ;;  %v3206_v18 = vadd.f32 %v2777_v40, %v962_v16  ;;  %v965_v48 = vmul.f32 %v2295_v15, %v2772_v38  ;;  %v756_v15 = vpop.f32.mrf.mxu0 }
 0x131   : > { %v2498_v7 = vpop.eup %2497  ;;  %1759 = vst.msk [vmem:[%s2942_s8 + $0x34] sm:$0xf] %vm1745_vm3, %v2147_v14  ;;  %2523 = vrcp.f32 %v1283_v20  ;;  %v1281_v23 = vadd.f32 1.0, %v2496_v47  ;;  %v931_v39 = vmul.f32 %v2772_v38, %v743_v26  ;;  %v3214_v29 = vmul.f32 -1.442695, %v3200_v1  ;;  %v884_v56 = vpop.f32.mrf.mxu1 }
 0x132   : > { %v2500_v35 = vpop.eup %2499  ;;  %v1470_v44 = vmul.f32 %v2498_v7, %v3000_v59  ;;  %2525 = vrcp.f32 %v1249_v41  ;;  %v963_v8 = vmul.f32 %v3219_v2, %v871_v54  ;;  %v3223_v38 = vmul.f32 -1.442695, %v3206_v18 }
 0x133   : > { %v2502_v17 = vpop.eup %2501  ;;  %2527 = vrcp.f32 %v1281_v23  ;;  %v1252_v53 = vadd.f32 1.0, %v2500_v35  ;;  %v936_v19 = vmul.f32 %v3219_v2, %v2266_v57  ;;  %v3232_v3 = vadd.f32 %v3229_v50, %v933_v13  ;;  %v2267_v57 = vpop.f32.mrf.mxu0 }
 0x134   : > { %v2504_v21 = vpop.eup %2503  ;;  %v2179_v59 = vpack.c.bf16 %v1470_v44, %v1470_v44  ;;  %v1284_v60 = vadd.f32 1.0, %v2502_v17  ;;  %2529 = vpow2.f32 %v2057_v22  ;;  %v968_v12 = vmul.f32 %v3219_v2, %v2298_v63 }
 0x135   : > { %v2506_v61 = vpop.eup %2505  ;;  %2531 = vrcp.f32 %v1252_v53  ;;  %v1250_v5 = vadd.f32 1.0, %v2504_v21  ;;  %v3236_v14 = vadd.f32 %v3229_v50, %v965_v48  ;;  %v3239_v20 = vadd.f32 %v3229_v50, %v931_v39 }
 0x136   : > { %v2508_v30 = vpop.eup %2507  ;;  %1791 = vst.msk [vmem:[%s2942_s8 + $0xb4] sm:$0xf] %vm1745_vm3, %v2179_v59  ;;  %2533 = vrcp.f32 %v1284_v60  ;;  %v1282_v40 = vadd.f32 1.0, %v2506_v61  ;;  %v3242_v47 = vadd.f32 %v3229_v50, %v963_v8  ;;  %v934_v41 = vmul.f32 %v3219_v2, %v756_v15 }
 0x137   : > { %v2510_v37 = vpop.eup %2509  ;;  %2535 = vrcp.f32 %v1250_v5  ;;  %v1255_v45 = vadd.f32 1.0, %v2508_v30  ;;  %v3246_v7 = vadd.f32 %v3229_v50, %v936_v19  ;;  %v966_v23 = vmul.f32 %v3219_v2, %v884_v56 }
 0x138   : > { %v2512_v58 = vpop.eup %2511  ;;  %2537 = vrcp.f32 %v1282_v40  ;;  %v1287_v31 = vadd.f32 1.0, %v2510_v37  ;;  %v2031_v17 = vmul.f32 -1.442695, %v3232_v3  ;;  %v3251_v53 = vadd.f32 %v3229_v50, %v968_v12  ;;  %v2299_v37 = vpop.f32.mrf.mxu1 }
 0x139   : > { %v2514_v51 = vpop.eup %2513  ;;  %2539 = vrcp.f32 %v1255_v45  ;;  %v1253_v62 = vadd.f32 1.0, %v2512_v58  ;;  %v2063_v60 = vmul.f32 -1.442695, %v3236_v14  ;;  %v2029_v13 = vmul.f32 -1.442695, %v3239_v20  ;;  %v759_v58 = vpop.f32.mrf.mxu0 }
 0x13a   : > { %v2516_v16 = vpop.eup %2515  ;;  %2541 = vrcp.f32 %v1287_v31  ;;  %v1285_v26 = vadd.f32 1.0, %v2514_v51  ;;  %v2061_v5 = vmul.f32 -1.442695, %v3242_v47  ;;  %v3258_v48 = vadd.f32 %v3229_v50, %v934_v41 }
 0x13b   : > { %v2518_v22 = vpop.eup %2517  ;;  %2543 = vrcp.f32 %v1253_v62  ;;  %v1256_v54 = vadd.f32 1.0, %v2516_v16  ;;  %v2034_v40 = vmul.f32 -1.442695, %v3246_v7  ;;  %v3263_v8 = vadd.f32 %v3229_v50, %v966_v23 }
 0x13c   : > { %v2520_v35 = vpop.eup %2519  ;;  %2545 = vrcp.f32 %v1285_v26  ;;  %v1288_v44 = vadd.f32 1.0, %v2518_v22  ;;  %v2066_v15 = vmul.f32 -1.442695, %v3251_v53  ;;  %v937_v56 = vmul.f32 %v3219_v2, %v2267_v57 }
 0x13d   : > { %v2522_v21 = vpop.eup %2521  ;;  %2547 = vrcp.f32 %v1256_v54  ;;  %v1254_v59 = vadd.f32 1.0, %v2520_v35  ;;  %v2064_v54 = vmul.f32 -1.442695, %v3263_v8 }
 0x13e   : > { %v2524_v63 = vpop.eup %2523  ;;  %v1443_v61 = vmul.f32 %v2522_v21, %v3016_v55  ;;  %2549 = vrcp.f32 %v1288_v44  ;;  %v887_v44 = vpop.f32.mrf.mxu1 }
 0x13f   : > { %v2526_v39 = vpop.eup %2525  ;;  %v1475_v30 = vmul.f32 %v2524_v63, %v3025_v25  ;;  %2551 = vrcp.f32 %v1254_v59 }
 0x140   : > { %v2528_v45 = vpop.eup %2527  ;;  %v2152_v19 = vpack.c.bf16 %v1443_v61, %v1443_v61  ;;  %v1441_v55 = vmul.f32 %v2526_v39, %v3030_v24  ;;  %2553 = vpow2.f32 %v3197_v0  ;;  %v969_v0 = vmul.f32 %v3219_v2, %v2299_v37 }
 0x141   : > { %v2530_v31 = vpop.eup %2529  ;;  %v2184_v25 = vpack.c.bf16 %v1475_v30, %v1475_v30  ;;  %v1473_v12 = vmul.f32 %v2528_v45, %v3041_v46  ;;  %2555 = vpow2.f32 %v3203_v49  ;;  %v935_v49 = vmul.f32 %v3219_v2, %v759_v58 }
 0x142   : > { %v2532_v51 = vpop.eup %2531  ;;  %1764 = vst.msk [vmem:[%s2942_s8 + $0x48] sm:$0xf] %vm1745_vm3, %v2152_v19  ;;  %v2150_v62 = vpack.c.bf16 %v1441_v55, %v1441_v55  ;;  %v1286_v24 = vadd.f32 1.0, %v2530_v31  ;;  %2557 = vpow2.f32 %v3214_v29  ;;  %v2032_v29 = vmul.f32 -1.442695, %v3258_v48 }
 0x143   : > { %v2534_v16 = vpop.eup %2533  ;;  %1796 = vst.msk [vmem:[%s2942_s8 + $0xc8] sm:$0xf] %vm1745_vm3, %v2184_v25  ;;  %v2182_v26 = vpack.c.bf16 %v1473_v12, %v1473_v12  ;;  %v1444_v46 = vmul.f32 %v2532_v51, %v3060_v11  ;;  %2559 = vpow2.f32 %v3223_v38  ;;  %v3289_v38 = vadd.f32 %v3229_v50, %v937_v56 }
 0x144   : > { %v2536_v41 = vpop.eup %2535  ;;  %1762 = vst.msk [vmem:[%s2942_s8 + $0x40] sm:$0xf] %vm1745_vm3, %v2150_v62  ;;  %v1476_v22 = vmul.f32 %v2534_v16, %v3064_v32  ;;  %2561 = vrcp.f32 %v1286_v24  ;;  %v3293_v59 = vadd.f32 %v3229_v50, %v969_v0  ;;  %v967_v30 = vmul.f32 %v3219_v2, %v887_v44 }
 0x145   : > { %v2538_v23 = vpop.eup %2537  ;;  %1794 = vst.msk [vmem:[%s2942_s8 + $0xc0] sm:$0xf] %vm1745_vm3, %v2182_v26  ;;  %v2153_v35 = vpack.c.bf16 %v1444_v46, %v1444_v46  ;;  %v1442_v11 = vmul.f32 %v2536_v41, %v3068_v33  ;;  %2563 = vpow2.f32 %v2031_v17  ;;  %v3299_v17 = vadd.f32 %v3229_v50, %v935_v49 }
 0x146   : > { %v2540_v57 = vpop.eup %2539  ;;  %v2185_v32 = vpack.c.bf16 %v1476_v22, %v1476_v22  ;;  %v1474_v21 = vmul.f32 %v2538_v23, %v3072_v36  ;;  %2565 = vpow2.f32 %v2063_v60  ;;  %v2067_v2 = vmul.f32 -1.442695, %v3293_v59 }
 0x147   : > { %v2542_v63 = vpop.eup %2541  ;;  %1765 = vst.msk [vmem:[%s2942_s8 + $0x4c] sm:$0xf] %vm1745_vm3, %v2153_v35  ;;  %v2151_v61 = vpack.c.bf16 %v1442_v11, %v1442_v11  ;;  %v1447_v33 = vmul.f32 %v2540_v57, %v3075_v27  ;;  %2567 = vpow2.f32 %v2029_v13  ;;  %v2035_v13 = vmul.f32 -1.442695, %v3289_v38 }
 0x148   : > { %v2544_v39 = vpop.eup %2543  ;;  %1797 = vst.msk [vmem:[%s2942_s8 + $0xcc] sm:$0xf] %vm1745_vm3, %v2185_v32  ;;  %v2183_v36 = vpack.c.bf16 %v1474_v21, %v1474_v21  ;;  %v1479_v60 = vmul.f32 %v2542_v63, %v3085_v9  ;;  %2569 = vpow2.f32 %v2061_v5 }
 0x149   : > { %v2546_v37 = vpop.eup %2545  ;;  %1763 = vst.msk [vmem:[%s2942_s8 + $0x44] sm:$0xf] %vm1745_vm3, %v2151_v61  ;;  %v2156_v45 = vpack.c.bf16 %v1447_v33, %v1447_v33  ;;  %v1445_v27 = vmul.f32 %v2544_v39, %v3091_v10  ;;  %2571 = vpow2.f32 %v2034_v40  ;;  %v2033_v40 = vmul.f32 -1.442695, %v3299_v17 }
 0x14a   : > { %v2548_v19 = vpop.eup %2547  ;;  %1795 = vst.msk [vmem:[%s2942_s8 + $0xc4] sm:$0xf] %vm1745_vm3, %v2183_v36  ;;  %v2188_v55 = vpack.c.bf16 %v1479_v60, %v1479_v60  ;;  %v1477_v9 = vmul.f32 %v2546_v37, %v3101_v28  ;;  %2573 = vpow2.f32 %v2066_v15  ;;  %v3321_v15 = vadd.f32 %v3229_v50, %v967_v30 }
 0x14b   : > { %v2550_v5 = vpop.eup %2549  ;;  %1768 = vst.msk [vmem:[%s2942_s8 + $0x58] sm:$0xf] %vm1745_vm3, %v2156_v45  ;;  %v2154_v58 = vpack.c.bf16 %v1445_v27, %v1445_v27  ;;  %v1448_v10 = vmul.f32 %v2548_v19, %v3121_v43  ;;  %2575 = vpow2.f32 %v2032_v29 }
 0x14c   : > { %v2552_v31 = vpop.eup %2551  ;;  %1800 = vst.msk [vmem:[%s2942_s8 + $0xd8] sm:$0xf] %vm1745_vm3, %v2188_v55  ;;  %v2186_v25 = vpack.c.bf16 %v1477_v9, %v1477_v9  ;;  %v1480_v28 = vmul.f32 %v2550_v5, %v3128_v4  ;;  %2577 = vpow2.f32 %v2064_v54 }
 0x14d   : > { %v2554_v12 = vpop.eup %2553  ;;  %1766 = vst.msk [vmem:[%s2942_s8 + $0x50] sm:$0xf] %vm1745_vm3, %v2154_v58  ;;  %v2157_v56 = vpack.c.bf16 %v1448_v10, %v1448_v10  ;;  %v1446_v43 = vmul.f32 %v2552_v31, %v3140_v6  ;;  %2579 = vpow2.f32 %v2035_v13  ;;  %v2065_v6 = vmul.f32 -1.442695, %v3321_v15 }
 0x14e   : > { %v2556_v51 = vpop.eup %2555  ;;  %1798 = vst.msk [vmem:[%s2942_s8 + $0xd0] sm:$0xf] %vm1745_vm3, %v2186_v25  ;;  %v2189_v62 = vpack.c.bf16 %v1480_v28, %v1480_v28  ;;  %v1259_v24 = vadd.f32 1.0, %v2554_v12  ;;  %2581 = vpow2.f32 %v2067_v2 }
 0x14f   : > { %v2558_v4 = vpop.eup %2557  ;;  %1769 = vst.msk [vmem:[%s2942_s8 + $0x5c] sm:$0xf] %vm1745_vm3, %v2157_v56  ;;  %v2155_v50 = vpack.c.bf16 %v1446_v43, %v1446_v43  ;;  %v1291_v0 = vadd.f32 1.0, %v2556_v51  ;;  %2583 = vpow2.f32 %v2033_v40 }
 0x150   : > { %v2560_v16 = vpop.eup %2559  ;;  %1801 = vst.msk [vmem:[%s2942_s8 + $0xdc] sm:$0xf] %vm1745_vm3, %v2189_v62  ;;  %2585 = vrcp.f32 %v1259_v24  ;;  %v1257_v26 = vadd.f32 1.0, %v2558_v4 }
 0x151   : > { %v2562_v46 = vpop.eup %2561  ;;  %1767 = vst.msk [vmem:[%s2942_s8 + $0x54] sm:$0xf] %vm1745_vm3, %v2155_v50  ;;  %2587 = vrcp.f32 %v1291_v0  ;;  %v1289_v49 = vadd.f32 1.0, %v2560_v16 }
 0x152   : > { %v2564_v41 = vpop.eup %2563  ;;  %v1478_v22 = vmul.f32 %v2562_v46, %v3170_v34  ;;  %2589 = vrcp.f32 %v1257_v26 }
 0x153   : > { %v2566_v29 = vpop.eup %2565  ;;  %2591 = vrcp.f32 %v1289_v49  ;;  %v1260_v54 = vadd.f32 1.0, %v2564_v41 }
 0x154   : > { %v2568_v23 = vpop.eup %2567  ;;  %v2187_v35 = vpack.c.bf16 %v1478_v22, %v1478_v22  ;;  %v1292_v11 = vadd.f32 1.0, %v2566_v29  ;;  %2593 = vpow2.f32 %v2065_v6 }
 0x155   : > { %v2570_v44 = vpop.eup %2569  ;;  %2595 = vrcp.f32 %v1260_v54  ;;  %v1258_v57 = vadd.f32 1.0, %v2568_v23 }
 0x156   : > { %v2572_v32 = vpop.eup %2571  ;;  %1799 = vst.msk [vmem:[%s2942_s8 + $0xd4] sm:$0xf] %vm1745_vm3, %v2187_v35  ;;  %2597 = vrcp.f32 %v1292_v11  ;;  %v1290_v21 = vadd.f32 1.0, %v2570_v44 }
 0x157   : > { %v2574_v63 = vpop.eup %2573  ;;  %2599 = vrcp.f32 %v1258_v57  ;;  %v1263_v61 = vadd.f32 1.0, %v2572_v32 }
 0x158   : > { %v2576_v34 = vpop.eup %2575  ;;  %2601 = vrcp.f32 %v1290_v21  ;;  %v1295_v33 = vadd.f32 1.0, %v2574_v63 }
 0x159   : > { %v2578_v39 = vpop.eup %2577  ;;  %2603 = vrcp.f32 %v1263_v61  ;;  %v1261_v36 = vadd.f32 1.0, %v2576_v34 }
 0x15a   : > { %v2580_v60 = vpop.eup %2579  ;;  %2605 = vrcp.f32 %v1295_v33  ;;  %v1293_v30 = vadd.f32 1.0, %v2578_v39 }
 0x15b   : > { %v2582_v37 = vpop.eup %2581  ;;  %2607 = vrcp.f32 %v1261_v36  ;;  %v1264_v45 = vadd.f32 1.0, %v2580_v60 }
 0x15c   : > { %v2584_v27 = vpop.eup %2583  ;;  %2609 = vrcp.f32 %v1293_v30  ;;  %v1296_v13 = vadd.f32 1.0, %v2582_v37 }
 0x15d   : > { %v2586_v19 = vpop.eup %2585  ;;  %2611 = vrcp.f32 %v1264_v45  ;;  %v1262_v55 = vadd.f32 1.0, %v2584_v27 }
 0x15e   : > { %v2588_v9 = vpop.eup %2587  ;;  %v1451_v2 = vmul.f32 %v2586_v19, %v3176_v42  ;;  %2613 = vrcp.f32 %v1296_v13 }
 0x15f   : > { %v2590_v5 = vpop.eup %2589  ;;  %v1483_v58 = vmul.f32 %v2588_v9, %v3182_v52  ;;  %2615 = vrcp.f32 %v1262_v55 }
 0x160   : > { %v2592_v10 = vpop.eup %2591  ;;  %v2160_v40 = vpack.c.bf16 %v1451_v2, %v1451_v2  ;;  %v1449_v31 = vmul.f32 %v2590_v5, %v3200_v1 }
 0x161   : > { %v2594_v25 = vpop.eup %2593  ;;  %v2192_v28 = vpack.c.bf16 %v1483_v58, %v1483_v58  ;;  %v1481_v12 = vmul.f32 %v2592_v10, %v3206_v18 }
 0x162   : > { %v2596_v56 = vpop.eup %2595  ;;  %1772 = vst.msk [vmem:[%s2942_s8 + $0x68] sm:$0xf] %vm1745_vm3, %v2160_v40  ;;  %v2158_v42 = vpack.c.bf16 %v1449_v31, %v1449_v31  ;;  %v1294_v43 = vadd.f32 1.0, %v2594_v25 }
 0x163   : > { %v2598_v51 = vpop.eup %2597  ;;  %1804 = vst.msk [vmem:[%s2942_s8 + $0xe8] sm:$0xf] %vm1745_vm3, %v2192_v28  ;;  %v2190_v52 = vpack.c.bf16 %v1481_v12, %v1481_v12  ;;  %v1452_v62 = vmul.f32 %v2596_v56, %v3232_v3 }
 0x164   : > { %v2600_v24 = vpop.eup %2599  ;;  %1770 = vst.msk [vmem:[%s2942_s8 + $0x60] sm:$0xf] %vm1745_vm3, %v2158_v42  ;;  %v1484_v1 = vmul.f32 %v2598_v51, %v3236_v14  ;;  %2617 = vrcp.f32 %v1294_v43 }
 0x165   : > { %v2602_v18 = vpop.eup %2601  ;;  %1802 = vst.msk [vmem:[%s2942_s8 + $0xe0] sm:$0xf] %vm1745_vm3, %v2190_v52  ;;  %v2161_v4 = vpack.c.bf16 %v1452_v62, %v1452_v62  ;;  %v1450_v50 = vmul.f32 %v2600_v24, %v3239_v20 }
 0x166   : > { %v2604_v0 = vpop.eup %2603  ;;  %v2193_v16 = vpack.c.bf16 %v1484_v1, %v1484_v1  ;;  %v1482_v26 = vmul.f32 %v2602_v18, %v3242_v47 }
 0x167   : > { %v2606_v3 = vpop.eup %2605  ;;  %1773 = vst.msk [vmem:[%s2942_s8 + $0x6c] sm:$0xf] %vm1745_vm3, %v2161_v4  ;;  %v2159_v6 = vpack.c.bf16 %v1450_v50, %v1450_v50  ;;  %v1455_v14 = vmul.f32 %v2604_v0, %v3246_v7 }
 0x168   : > { %v2608_v46 = vpop.eup %2607  ;;  %1805 = vst.msk [vmem:[%s2942_s8 + $0xec] sm:$0xf] %vm1745_vm3, %v2193_v16  ;;  %v2191_v49 = vpack.c.bf16 %v1482_v26, %v1482_v26  ;;  %v1487_v41 = vmul.f32 %v2606_v3, %v3251_v53 }
 0x169   : > { %v2610_v20 = vpop.eup %2609  ;;  %1771 = vst.msk [vmem:[%s2942_s8 + $0x64] sm:$0xf] %vm1745_vm3, %v2159_v6  ;;  %v2164_v22 = vpack.c.bf16 %v1455_v14, %v1455_v14  ;;  %v1453_v47 = vmul.f32 %v2608_v46, %v3258_v48 }
 0x16a   : > { %v2612_v29 = vpop.eup %2611  ;;  %1803 = vst.msk [vmem:[%s2942_s8 + $0xe4] sm:$0xf] %vm1745_vm3, %v2191_v49  ;;  %v2196_v7 = vpack.c.bf16 %v1487_v41, %v1487_v41  ;;  %v1485_v54 = vmul.f32 %v2610_v20, %v3263_v8 }
 0x16b   : > { %v2614_v23 = vpop.eup %2613  ;;  %1776 = vst.msk [vmem:[%s2942_s8 + $0x78] sm:$0xf] %vm1745_vm3, %v2164_v22  ;;  %v2162_v53 = vpack.c.bf16 %v1453_v47, %v1453_v47  ;;  %v1456_v35 = vmul.f32 %v2612_v29, %v3289_v38 }
 0x16c   : > { %v2616_v11 = vpop.eup %2615  ;;  %1808 = vst.msk [vmem:[%s2942_s8 + $0xf8] sm:$0xf] %vm1745_vm3, %v2196_v7  ;;  %v2194_v48 = vpack.c.bf16 %v1485_v54, %v1485_v54  ;;  %v1488_v44 = vmul.f32 %v2614_v23, %v3293_v59 }
 0x16d   : > { %1774 = vst.msk [vmem:[%s2942_s8 + $0x70] sm:$0xf] %vm1745_vm3, %v2162_v53  ;;  %v2165_v57 = vpack.c.bf16 %v1456_v35, %v1456_v35  ;;  %v1454_v8 = vmul.f32 %v2616_v11, %v3299_v17 }
 0x16e   : > { %1806 = vst.msk [vmem:[%s2942_s8 + $0xf0] sm:$0xf] %vm1745_vm3, %v2194_v48  ;;  %v2197_v32 = vpack.c.bf16 %v1488_v44, %v1488_v44 }
 0x16f   : > { %1777 = vst.msk [vmem:[%s2942_s8 + $0x7c] sm:$0xf] %vm1745_vm3, %v2165_v57  ;;  %v2163_v21 = vpack.c.bf16 %v1454_v8, %v1454_v8 }
 0x170   : > { %1809 = vst.msk [vmem:[%s2942_s8 + $0xfc] sm:$0xf] %vm1745_vm3, %v2197_v32 }
 0x171   : > { %v2618_v38 = vpop.eup %2617  ;;  %1775 = vst.msk [vmem:[%s2942_s8 + $0x74] sm:$0xf] %vm1745_vm3, %v2163_v21 }
 0x172   : > { %v1486_v63 = vmul.f32 %v2618_v38, %v3321_v15 }
 0x174   : > { %v2195_v61 = vpack.c.bf16 %v1486_v63, %v1486_v63 }
 0x176   : > { %1807 = vst.msk [vmem:[%s2942_s8 + $0xf4] sm:$0xf] %vm1745_vm3, %v2195_v61 }
 0x177 PF: > { %s14_s17 = sadd.s32 1, %s2643_s17   ;;  %s3400_s15 = smov %s2639_s16 }
 0x178   : > { %p11_p5 = scmp.ge.s32.totalorder %s14_s17, 6   ;;  %s3401_s16 = smov %s3403_s18 }
 0x17a   :  { %13 = sbr.rel (!%p11_p5) target bundleno = 2 (0x2), region = 75 }

</bundles_post_ra>
